<compile_context>
chip_gen: v5e
topology: v5e:2x2
jax: 0.10.0
libtpu: 0.0.40
codegen_flags: <defaults>
</compile_context>

<pallas_src>
import jax
import jax.numpy as jnp
from jax import lax
from jax.experimental import pallas as pl
from jax.experimental.pallas import tpu as pltpu


def _round_up(x: int, m: int) -> int:
    return (x + m - 1) // m * m


def _linear_kernel(x_ref, w_ref, b_ref, o_ref):
    """One (tm, tn) output tile; K is the innermost grid axis.

    The output tile is the accumulator (f32, resident across K because its
    BlockSpec index is independent of k): it is seeded with the bias at k == 0
    and accumulated into on every K step, so the bias is added exactly once and
    no scratch accumulator / finalize branch is needed.
    """
    k = pl.program_id(2)

    @pl.when(k == 0)
    def _():
        o_ref[...] = jnp.zeros_like(o_ref) + b_ref[...]  # broadcast (1, tn) -> (tm, tn)

    # Plain NN contraction on the MXU: x tile (tm, tk) @ w tile (tk, tn).
    o_ref[...] += jnp.dot(x_ref[...], w_ref[...], preferred_element_type=jnp.float32)


def prepare_linear_params(weight, bias, *, tn=512, tk=1024, compute_dtype=jnp.float32):
    """One-time (init-time) parameter preparation.

    * Pads the PyTorch (Out, In) weight to (tk, tn) tile multiples and
      transposes it to (In, Out) K-major layout.  Doing this once here keeps a
      full HBM read+write of the largest operand out of every forward call and
      removes any chance of per-tile XLU transposes inside the kernel.
    * Bias is padded and reshaped to (1, Outp); it stays f32 (it seeds the f32
      accumulator).
    * `compute_dtype=jnp.bfloat16` halves HBM bytes for the weight on
      mem-bound shapes (accumulation stays f32).

    Returns (w_t, b, meta) where meta = (Out, In, tn, tk).
    """
    Out, In = weight.shape
    assert bias.shape == (Out,)

    tn = min(tn, _round_up(Out, 128))  # lane-dim tile: multiple of 128
    tk = min(tk, _round_up(In, 128))
    Outp, Inp = _round_up(Out, tn), _round_up(In, tk)

    w_t = jnp.pad(weight, ((0, Outp - Out), (0, Inp - In))).T  # (Inp, Outp), once
    w_t = w_t.astype(compute_dtype)
    b = jnp.pad(bias, (0, Outp - Out)).reshape(1, Outp).astype(jnp.float32)
    return w_t, b, (Out, In, tn, tk)


def linear_forward(x, w_t, b, meta, *, tm=512):
    """y = x @ W.T + b using prepared params (see prepare_linear_params).

    x:   (B, In) float/bf16
    w_t: (Inp, Outp) prepared weight (K-major)
    b:   (1, Outp) float32
    returns (B, Out) float32
    """
    Out, In, tn, tk = meta
    Inp, Outp = w_t.shape
    B, In_x = x.shape
    assert In_x == In

    # Sublane-dim tile: multiple of 8, capped to the (padded) batch.
    tm = min(tm, _round_up(B, 8))

    # Megacore (v7x, 2 TCs): make sure the parallel M x N block grid has >= 2
    # blocks when possible, otherwise one TensorCore sits idle.
    if pl.cdiv(B, tm) * (Outp // tn) == 1:
        if tn >= 256:
            tn //= 2          # Outp stays a multiple of tn
        elif tm % 16 == 0:
            tm //= 2          # stays a multiple of 8

    Bp = _round_up(B, tm)
    xp = x if (Bp == B and Inp == In) else jnp.pad(x, ((0, Bp - B), (0, Inp - In)))
    xp = xp.astype(w_t.dtype)

    grid = (Bp // tm, Outp // tn, Inp // tk)

    out = pl.pallas_call(
        _linear_kernel,
        out_shape=jax.ShapeDtypeStruct((Bp, Outp), jnp.float32),
        grid_spec=pltpu.PrefetchScalarGridSpec(
            num_scalar_prefetch=0,
            grid=grid,
            in_specs=[
                pl.BlockSpec((tm, tk), lambda i, j, k: (i, k)),   # x
                pl.BlockSpec((tk, tn), lambda i, j, k: (k, j)),   # weight (In, Out)
                pl.BlockSpec((1, tn), lambda i, j, k: (0, j)),    # bias
            ],
            out_specs=pl.BlockSpec((tm, tn), lambda i, j, k: (i, j)),
        ),
        compiler_params=pltpu.CompilerParams(
            # M/N parallel (sharded across v7x's 2 TensorCores); K innermost,
            # 'arbitrary' (the output tile is carried across it).
            dimension_semantics=("parallel", "parallel", "arbitrary"),
            vmem_limit_bytes=48 * 1024 * 1024,
        ),
        cost_estimate=pl.CostEstimate(
            flops=2 * Bp * Inp * Outp,
            bytes_accessed=(xp.dtype.itemsize * Bp * Inp
                            + w_t.dtype.itemsize * Inp * Outp
                            + 4 * Bp * Outp + 4 * Outp),
            transcendentals=0,
        ),
    )(xp, w_t, b)

    if Bp == B and Outp == Out:
        return out
    return out[:B, :Out]


def linear_regressor(x, weight, bias, *, tm=512, tn=512, tk=1024,
                     compute_dtype=jnp.float32):
    """Convenience one-shot wrapper (prep + forward).

    In a real model, call prepare_linear_params once at init and reuse the
    prepared params across forward calls.
    """
    B, In = x.shape
    Out = weight.shape[0]

    # Tiny-shape fast path: at/below one (8, 128) tile the pallas_call's fixed
    # cost (grid setup, padding copies, DMAs) is pure overhead vs. XLA.
    if B <= 8 and In <= 128 and Out <= 128:
        return x @ weight.T + bias

    w_t, b, meta = prepare_linear_params(weight, bias, tn=tn, tk=tk,
                                         compute_dtype=compute_dtype)
    return linear_forward(x, w_t, b, meta, tm=tm)


if __name__ == "__main__":
    key = jax.random.PRNGKey(0)

    # --- Case 1: literal module spec — LinearRegressor(1, 1) on x = [[6],[7],[8],[9]]
    # (hits the tiny-shape fast path by design).
    k1, k2, key = jax.random.split(key, 3)
    w1 = jax.random.uniform(k1, (1, 1), jnp.float32, -1.0, 1.0)
    b1 = jax.random.uniform(k2, (1,), jnp.float32, -1.0, 1.0)
    x1 = jnp.array([[6.0], [7.0], [8.0], [9.0]], jnp.float32)
    y1 = linear_regressor(x1, w1, b1)
    jax.block_until_ready(y1)
    assert jnp.allclose(y1, x1 @ w1.T + b1, atol=1e-5, rtol=1e-5), "case 1 mismatch"

    # --- Case 2: Pallas path with misaligned shapes + small tiles to exercise the
    # full (M, N, K) grid, K accumulation, bias-once init, padding and slicing.
    kx, kw, kb, key = jax.random.split(key, 4)
    B, In, Out = 20, 300, 200
    bound = 1.0 / (In ** 0.5)
    w2 = jax.random.uniform(kw, (Out, In), jnp.float32, -bound, bound)
    b2 = jax.random.uniform(kb, (Out,), jnp.float32, -bound, bound)
    x2 = jax.random.normal(kx, (B, In), jnp.float32)
    wt2, bb2, meta2 = prepare_linear_params(w2, b2, tn=128, tk=128)  # init-time prep
    y2 = linear_forward(x2, wt2, bb2, meta2, tm=8)
    jax.block_until_ready(y2)
    ref2 = jnp.dot(x2, w2.T, precision=lax.Precision.HIGHEST) + b2
    assert jnp.allclose(y2, ref2, atol=2e-3, rtol=2e-3), "case 2 mismatch"

    # --- Case 3: default (big) tiles on aligned shapes — no padding, no output
    # slice, megacore split of the N axis so both TCs get work on v7x.
    kx, kw, kb = jax.random.split(key, 3)
    B, In, Out = 256, 1024, 512
    bound = 1.0 / (In ** 0.5)
    w3 = jax.random.uniform(kw, (Out, In), jnp.float32, -bound, bound)
    b3 = jax.random.uniform(kb, (Out,), jnp.float32, -bound, bound)
    x3 = jax.random.normal(kx, (B, In), jnp.float32)
    wt3, bb3, meta3 = prepare_linear_params(w3, b3)
    y3 = linear_forward(x3, wt3, bb3, meta3)
    jax.block_until_ready(y3)
    ref3 = jnp.dot(x3, w3.T, precision=lax.Precision.HIGHEST) + b3
    assert jnp.allclose(y3, ref3, atol=1e-2, rtol=1e-2), "case 3 mismatch"

    print("KERNEL_OK")
</pallas_src>

<mosaic_0001>
module attributes {stable_mosaic.version = 11 : i64} {
  func.func @_linear_kernel(%arg0: i32, %arg1: i32, %arg2: i32, %arg3: memref<8x128xf32, #tpu.memory_space<vmem>>, %arg4: memref<128x128xf32, #tpu.memory_space<vmem>>, %arg5: memref<1x128xf32, #tpu.memory_space<vmem>>, %arg6: memref<8x128xf32, #tpu.memory_space<vmem>>) attributes {dimension_semantics = [#tpu.dimension_semantics<parallel>, #tpu.dimension_semantics<parallel>, #tpu.dimension_semantics<arbitrary>], iteration_bounds = array<i64: 3, 2, 3>, scalar_prefetch = 0 : i64, scratch_operands = 0 : i64, tpu.core_type = #tpu.core_type<tc>, window_params = [{transform_indices = @transform_0, window_bounds = array<i64: 8, 128>}, {transform_indices = @transform_1, window_bounds = array<i64: 128, 128>}, {transform_indices = @transform_2, window_bounds = array<i64: 1, 128>}, {transform_indices = @transform_3, window_bounds = array<i64: 8, 128>}]} {
    %c0_i32 = arith.constant 0 : i32
    %0 = arith.cmpi eq, %arg2, %c0_i32 : i32
    %1 = arith.extui %0 : i1 to i32
    %c0_i32_0 = arith.constant 0 : i32
    %2 = arith.cmpi ne, %1, %c0_i32_0 : i32
    scf.if %2 {
      %cst_8 = arith.constant 0.000000e+00 : f32
      %9 = vector.broadcast %cst_8 : f32 to vector<8x128xf32>
      %c0_9 = arith.constant 0 : index
      %c0_10 = arith.constant 0 : index
      %10 = vector.load %arg5[%c0_9, %c0_10] : memref<1x128xf32, #tpu.memory_space<vmem>>, vector<1x128xf32>
      %11 = vector.broadcast %10 : vector<1x128xf32> to vector<8x128xf32>
      %12 = arith.addf %9, %11 : vector<8x128xf32>
      %c0_11 = arith.constant 0 : index
      %c0_12 = arith.constant 0 : index
      %13 = vector.load %arg6[%c0_11, %c0_12] : memref<8x128xf32, #tpu.memory_space<vmem>>, vector<8x128xf32>
      tpu.vector_store %arg6[%c0_11, %c0_12], %12 {strides = array<i32>} : memref<8x128xf32, #tpu.memory_space<vmem>>, vector<8x128xf32>,
    } else {
    }
    %c0 = arith.constant 0 : index
    %c0_1 = arith.constant 0 : index
    %3 = vector.load %arg6[%c0, %c0_1] : memref<8x128xf32, #tpu.memory_space<vmem>>, vector<8x128xf32>
    %c0_2 = arith.constant 0 : index
    %c0_3 = arith.constant 0 : index
    %4 = vector.load %arg3[%c0_2, %c0_3] : memref<8x128xf32, #tpu.memory_space<vmem>>, vector<8x128xf32>
    %c0_4 = arith.constant 0 : index
    %c0_5 = arith.constant 0 : index
    %5 = vector.load %arg4[%c0_4, %c0_5] : memref<128x128xf32, #tpu.memory_space<vmem>>, vector<128x128xf32>
    %cst = arith.constant dense<0.000000e+00> : vector<8x128xf32>
    %6 = tpu.matmul %4, %5, %cst {dimension_numbers = #tpu.dot_dimension_numbers<[1], [0], [0], [1], [0, 0, 1, 1], [], []>} : vector<8x128xf32>, vector<128x128xf32>, vector<8x128xf32> -> vector<8x128xf32>
    %7 = arith.addf %3, %6 : vector<8x128xf32>
    %c0_6 = arith.constant 0 : index
    %c0_7 = arith.constant 0 : index
    %8 = vector.load %arg6[%c0_6, %c0_7] : memref<8x128xf32, #tpu.memory_space<vmem>>, vector<8x128xf32>
    tpu.vector_store %arg6[%c0_6, %c0_7], %7 {strides = array<i32>} : memref<8x128xf32, #tpu.memory_space<vmem>>, vector<8x128xf32>,
    return
  }
  func.func @transform_0(%arg0: i32, %arg1: i32, %arg2: i32) -> (i32, i32) {
    %c0_i32 = arith.constant 0 : i32
    return %arg0, %arg2 : i32, i32
  }
  func.func @transform_1(%arg0: i32, %arg1: i32, %arg2: i32) -> (i32, i32) {
    %c0_i32 = arith.constant 0 : i32
    return %arg2, %arg1 : i32, i32
  }
  func.func @transform_2(%arg0: i32, %arg1: i32, %arg2: i32) -> (i32, i32) {
    %c0_i32 = arith.constant 0 : i32
    %c0_i32_0 = arith.constant 0 : i32
    return %c0_i32, %arg1 : i32, i32
  }
  func.func @transform_3(%arg0: i32, %arg1: i32, %arg2: i32) -> (i32, i32) {
    %c0_i32 = arith.constant 0 : i32
    return %arg0, %arg1 : i32, i32
  }
}

</mosaic_0001>

<bundles_post_ra>
// kernel: tpu_custom_call.1
= control target key start
LH: loop header
LB: loop body
LE: loop exit
PB: predicated region body
PF: predicated region fallthrough
CT: control target
= control target key end

     0   :  { %s1374_s0 = inlined_call_operand.hbm [shape: f32[24,384], index: 0, kind: input, shape index: {}]   ;;  %s1375_s1 = inlined_call_operand.hbm [shape: f32[384,256], index: 1, kind: input, shape index: {}]   ;;  %s1376_s2 = inlined_call_operand.hbm [shape: f32[1,256], index: 2, kind: input, shape index: {}]   ;;  %s1377_s3 = inlined_call_operand.hbm [shape: f32[24,256], index: 3, kind: output, shape index: {}]  }
   0x1   :  { %1392 = sst [smem:[#allocation28_spill]] %s1375_s1 }
   0x2   :  { %1393 = sst [smem:[#allocation29_spill]] %s1377_s3 }
   0x3   :  { %8 = vsyncpa [#allocation3], 0 }
   0x4   :  { %10 = vsyncpa [#allocation3 + $0x1], 0 }
   0x5   :  { %11 = vsyncpa [#allocation6], 0 }
   0x6   :  { %13 = vsyncpa [#allocation6 + $0x1], 0 }
   0x7   :  { %14 = vsyncpa [#allocation4], 0 }
   0x8   :  { %16 = vsyncpa [#allocation4 + $0x1], 0  ;;  %s1003_s12 = smov 0   ;;  %s1005_s13 = smov 0  }
   0x9   :  { %s1007_s14 = smov 0   ;;  %s1009_s15 = smov 0  }
   0xa   :  { %s1011_s16 = smov 0   ;;  %s1013_s17 = smov 0  }
   0xb   :  { %s1015_s18 = smov 0   ;;  %s1017_s19 = smov 0  }
   0xc   :  { %s1019_s20 = smov 0   ;;  %s1021_s21 = smov 0  }
   0xd   :  { %s1023_s22 = smov 0   ;;  %s1025_s23 = smov 0  }
   0xe   :  { %s1027_s24 = smov 0   ;;  %s1029_s25 = smov 0  }
   0xf   :  { %s1031_s26 = smov 0   ;;  %s1033_s27 = smov 0  }
  0x10   :  { %s1035_s28 = smov 0   ;;  %s1037_s29 = smov 0  }
  0x11   :  { %s1039_s30 = smov 0  }
  0x12 LB: > { %1394 = sst [smem:[#allocation13_spill]] %s938_s20  ;;  %p1385_p0 = scmp.eq.s32.totalorder %s978_s30, 0  ;;  %s978_s30 = sphi %s1039_s30, %s22_s30   ;;  %s974_s29 = sphi %s1037_s29, %s1440_s29   ;;  %s970_s28 = sphi %s1035_s28, %s1453_s28   ;;  %s966_s27 = sphi %s1033_s27, %s1452_s27   ;;  %s962_s26 = sphi %s1031_s26, %s1435_s26   ;;  %s958_s25 = sphi %s1029_s25, %s1451_s25   ;;  %s954_s24 = sphi %s1027_s24, %s1450_s24   ;;  %s950_s23 = sphi %s1025_s23, %s1434_s23   ;;  %s946_s22 = sphi %s1023_s22, %s1449_s22   ;;  %s942_s21 = sphi %s1021_s21, %s1448_s21   ;;  %s938_s20 = sphi %s1019_s20, %s1431_s20   ;;  %s934_s19 = sphi %s1017_s19, %s1447_s19   ;;  %s930_s18 = sphi %s1015_s18, %s1446_s18   ;;  %s926_s17 = sphi %s1013_s17, %s1445_s17   ;;  %s922_s16 = sphi %s1011_s16, %s1444_s16   ;;  %s918_s15 = sphi %s1009_s15, %s1442_s15   ;;  %s914_s14 = sphi %s1007_s14, %s1441_s14   ;;  %s910_s13 = sphi %s1005_s13, %s1439_s13   ;;  %s906_s12 = sphi %s1003_s12, %s1437_s12  }
  0x13   : > { %1395 = sst [smem:[#allocation14_spill]] %s946_s22  ;;  %p85_p1 = scmp.ne.s32.totalorder %s938_s20, %s934_s19 }
  0x14   : > { %1396 = sst [smem:[#allocation15_spill]] %s950_s23  ;;  %p91_p2 = scmp.ne.s32.totalorder %s934_s19, %s930_s18 }
  0x15   : > { %1397 = sst [smem:[#allocation16_spill]] %s954_s24  ;;  %p536_p3 = scmp.lt.s32.totalorder %s978_s30, 18 }
  0x16   : > { %1398 = sst [smem:[#allocation17_spill]] %s958_s25  ;;  %p87_p4 = por %p85_p1, %p1385_p0 }
  0x17   : > { %1399 = sst [smem:[#allocation18_spill]] %s962_s26  ;;  %s190_s5 = sand.u32 1, %s978_s30  }
  0x18   : > { %1400 = sst [smem:[#allocation19_spill]] %s974_s29  ;;  %s192_s6 = sand.u32 1, %s938_s20  }
  0x19   : > { %s498_s7 = sshll.u32 %s192_s6, 7  ;;  %s512_s8 = sshll.u32 %s966_s27, 5 }
  0x1a   : > { %s199_s9 = sadd.s32 %s970_s28, %s512_s8  ;;  %s194_s11 = scalar_lea.vmem [#allocation5], %s498_s7 }
  0x1b   : > { %s501_s10 = sshll.u32 %s199_s9, 3  ;;  %s204_s3 = sshll.u32 %s194_s11, 4  ;;  %s205_s3 = int_to_ptr.vmem [resolvable:$true] %s204_s3 }
  0x1c   : > { %s1401_s1 = sld [smem:[#allocation28_spill]]  ;;  %p526_p5 = pnand %p536_p3, %p87_p4 }
  0x1d   : > { %p502_p6 = scmp.ge.s32.totalorder %s978_s30, 1  ;;  %s1117_s6 = scalar_lea.sflag [#allocation6], %s190_s5 }
  0x1e   : > { %s980_s7 = smov 256   ;;  %s981_s25 = smov 128  }
  0x1f   : > { %s982_s4 = smov 8   ;;  %p229_p7 = scmp.lt.s32.totalorder %s978_s30, 19 }
  0x20   : > { %s1126_s8 = sadd.s32 4294967295, %s978_s30   ;;  %s34_s9 = sadd.s32 1, %s966_s27 }
  0x21   : > { %p1121_p8 = pnand %p502_p6, %p229_p7  ;;  %p35_p9 = scmp.ge.s32.totalorder %s34_s9, 3 }
  0x22   : > { %s201_s26 = scalar_lea.hbm %s1401_s1, %s501_s10  ;;  %s37_s10 = sadd.s32 1, %s970_s28 }
  0x23   : > { %s202_s24 = sshll.u32 %s201_s26, 4  ;;  %s41_s11 = sadd.s32 1, %s974_s29  ;;  %s203_s24 = int_to_ptr.hbm [resolvable:$true] %s202_s24 }
  0x24   : > { %528 = dma.hbm_to_vmem [thread:$0]  (!%p526_p5), %s203_s24, 2048, %s205_s3, %s1117_s6, %s980_s7, %s981_s25, %s982_s4  }
  0x25   : > { %s1402_s26 = scalar_select %p1121_p8, 1, 0 }
  0x26   : > { %s50_s3 = sadd.s32 1, %s950_s23  ;;  %p57_p10 = scmp.ne.s32.totalorder %s950_s23, %s946_s22 }
  0x27   : > { %1403 = sst [smem:[#allocation20_spill]] %s1402_s26  ;;  %s1455_s9 = smov (%p35_p9, %s34_s9), 0 }
  0x28   : > { %1404 = sst [smem:[#allocation21_spill]] %s1455_s9  ;;  %s1457_s10 = smov (!%p35_p9, %s37_s10), %s970_s28 }
  0x29   : > { %s46_s24 = ssub.s32 %s966_s27, %s1455_s9  ;;  %p1142_p11 = por %p1385_p0, %p57_p10 }
  0x2a   : > { %p39_p12 = scmp.ge.s32.totalorder %s1457_s10, 2  ;;  %p63_p13 = scmp.ne.s32.totalorder %s946_s22, %s942_s21 }
  0x2b   : > { %p64_p1 = scmp.eq.s32.totalorder %s1126_s8, 0  ;;  %s132_s25 = sadd.s32 1, %s914_s14 }
  0x2c   : > { %s1459_s10 = smov (%p39_p12, %s1457_s10), 0  ;;  %s1461_s11 = smov (!%p39_p12, %s41_s11), %s974_s29 }
  0x2d   : > { %1406 = sst [smem:[#allocation22_spill]] %s1459_s10  ;;  %p1155_p4 = por %p64_p1, %p63_p13 }
  0x2e   : > { %s1161_s5 = ssub.s32 %s970_s28, %s1459_s10  ;;  %p43_p5 = scmp.ge.s32.totalorder %s1461_s11, 3 }
  0x2f   : > { %s1407_s4 = scalar_select %p1155_p4, 1, 0 }
  0x30   : > { %s75_s21 = sor.u32 %s1161_s5, %s46_s24  ;;  %p1169_p7 = por %p91_p2, %p64_p1 }
  0x31   : > { %1408 = sst [smem:[#allocation23_spill]] %s1407_s4  ;;  %p76_p6 = scmp.eq.s32.totalorder %s75_s21, 0 }
  0x32   : > { %s1409_s1 = scalar_select %p1169_p7, 1, 0 }
  0x33   : > { %s1463_s11 = smov (%p43_p5, %s1461_s11), 0  ;;  %s1412_s9 = sadd.s32 1, %s938_s20 }
  0x34   : > { %1410 = sst [smem:[#allocation24_spill]] %s1409_s1  ;;  %s45_s4 = ssub.s32 %s974_s29, %s1463_s11 }
  0x35   : > { %1411 = sst [smem:[#allocation25_spill]] %s1463_s11  ;;  %p142_p9 = scmp.ne.s32.totalorder %s914_s14, %s910_s13 }
  0x36   : > { %s1178_s10 = scalar_select %p76_p6, %s938_s20, %s1412_s9  }
  0x37   : > { %s47_s22 = sor.u32 %s46_s24, %s45_s4  ;;  %s129_s26 = sor.u32 %s1161_s5, %s45_s4 }
  0x38   : > { %1413 = sst [smem:[#allocation26_spill]] %s1178_s10  ;;  %p48_p10 = scmp.eq.s32.totalorder %s47_s22, 0 }
  0x39   : > { %p130_p12 = scmp.eq.s32.totalorder %s129_s26, 0  ;;  %p143_p13 = scmp.eq.s32.totalorder %s1126_s8, 17 }
  0x3a   : > { %p148_p0 = scmp.ne.s32.totalorder %s910_s13, %s906_s12  ;;  %s1416_s9 = sadd.s32 4294967294, %s978_s30  }
  0x3b   : > { %s1189_s18 = scalar_select %p48_p10, %s950_s23, %s50_s3  }
  0x3c   : > { %s1192_s21 = scalar_select %p130_p12, %s914_s14, %s132_s25  }
  0x3d   : > { %1414 = sst [smem:[#allocation27_spill]] %s1189_s18  ;;  %p1194_p2 = por %p143_p13, %p142_p9 }
  0x3e   : > { %p149_p5 = scmp.eq.s32.totalorder %s1416_s9, 17  ;;  %s169_s11 = sand.u32 1, %s950_s23  }
  0x3f   : > { %s513_s24 = smul.u32 3, %s974_s29  ;;  %s496_s26 = sshll.u32 %s169_s11, 3 }
  0x40   : > { %p1202_p6 = por %p149_p5, %p148_p0  ;;  %s173_s29 = scalar_lea.vmem [#allocation2], %s496_s26 }
  0x41   : > { %s177_s3 = sadd.s32 %s966_s27, %s513_s24  ;;  %s183_s23 = sshll.u32 %s173_s29, 4  ;;  %s184_s23 = int_to_ptr.vmem [resolvable:$true] %s183_s23 }
  0x42   : > { %s1417_s22 = scalar_select %p1202_p6, 1, 0 }
  0x43   : > { %s497_s25 = sshll.u32 %s177_s3, 3  ;;  %p523_p0 = pnand %p536_p3, %p1142_p11 }
  0x44   : > { %s179_s9 = scalar_lea.hbm %s1374_s0, %s497_s25  ;;  %s170_s20 = scalar_lea.sflag [#allocation3], %s169_s11 }
  0x45   : > { %s181_s10 = sshll.u32 %s179_s9, 4  ;;  %p102_p9 = scmp.eq.s32.totalorder %s1161_s5, 0  ;;  %s182_s10 = int_to_ptr.hbm [resolvable:$true] %s181_s10 }
  0x46   : > { %525 = dma.hbm_to_vmem [thread:$0]  (!%p523_p0), %s182_s10, 128, %s184_s23, %s170_s20  }
  0x47   : > { %s104_s24 = sadd.s32 1, %s926_s17  ;;  %p111_p10 = scmp.ne.s32.totalorder %s926_s17, %s922_s16 }
  0x48   : > { %s1219_s18 = scalar_select %p102_p9, %s926_s17, %s104_s24  }
  0x49   : > { %p1418_p12 = scmp.eq.s32.totalorder %s978_s30, 0  ;;  %p117_p5 = scmp.ne.s32.totalorder %s922_s16, %s918_s15 }
  0x4a   : > { %s216_s26 = sand.u32 1, %s926_s17   ;;  %s220_s25 = scalar_lea.hbm %s1376_s2, %s970_s28 }
  0x4b   : > { %p113_p13 = por %p111_p10, %p1418_p12  ;;  %p1232_p6 = por %p117_p5, %p64_p1 }
  0x4c   : > { %s222_s20 = sshll.u32 %s220_s25, 4  ;;  %s217_s23 = scalar_lea.vmem [#allocation7], %s216_s26  ;;  %s223_s20 = int_to_ptr.hbm [resolvable:$true] %s222_s20 }
  0x4d   : > { %s224_s5 = sshll.u32 %s217_s23, 4  ;;  %p529_p11 = pnand %p536_p3, %p113_p13  ;;  %s225_s5 = int_to_ptr.vmem [resolvable:$true] %s224_s5 }
  0x4e   : > { %233 = sbr.rel (%p1121_p8) target bundleno = 273 (0x111), region = 32  ;;  %s1421_s15 = sld [smem:[#allocation14_spill]] (!%p1121_p8) }
  0x4f   : > { %531 = dma.hbm_to_vmem [thread:$0]  (!%p529_p11), %s223_s20, 16, %s225_s5, %s1117_s6  }
  0x54   : > { %s235_s4 = sand.u32 1, %s1421_s15  }
  0x55   : > { %s1242_s9 = sshll.u32 %s235_s4, 3  ;;  %s236_s24 = scalar_lea.sflag [#allocation3], %s235_s4 }
  0x56   : > { %s239_s29 = scalar_lea.vmem [#allocation2], %s1242_s9 }
  0x57   : > { %889 = dma.done.wait (%p1155_p4), %s236_s24, 128  }
  0x58   : > { %891 = vsyncadd (%p1155_p4), %s236_s24, 4294967168  ;;  %s245_s6 = sand.u32 1, %s1126_s8   ;;  %s247_s3 = sand.u32 1, %s934_s19  }
  0x59   : > { %s504_s25 = sshll.u32 %s247_s3, 7  ;;  %s246_s20 = scalar_lea.sflag [#allocation6], %s245_s6 }
  0x5a   : > { %s1251_s23 = scalar_lea.vmem [#allocation5], %s504_s25 }
  0x5b   : > { %893 = dma.done.wait (%p1169_p7), %s246_s20, 2048  }
  0x5c   : > { %895 = vsyncadd (%p1169_p7), %s246_s20, 4294965248  ;;  %s257_s5 = sand.u32 1, %s922_s16  }
  0x5d   : > { %s258_s10 = scalar_lea.vmem [#allocation7], %s257_s5 }
  0x5e   : > { %897 = dma.done.wait (%p1232_p6), %s246_s20, 16  }
  0x5f   : > { %899 = vsyncadd (%p1232_p6), %s246_s20, 4294967280  ;;  %s288_s8 = sand.u32 1, %s910_s13   ;;  %s1424_s4 = sld [smem:[#allocation16_spill]] }
  0x60   : > { %s505_s15 = sshll.u32 %s288_s8, 3 }
  0x61   : > { %s1265_s11 = scalar_lea.vmem [#allocation8], %s505_s15 }
  0x65   : > { %p506_p3 = scmp.ne.s32.totalorder %s1424_s4, 0 }
  0x67   : > { %295 = sbr.rel (%p506_p3) target bundleno = 110 (0x6e), region = 48 }
  0x6c   : > { %v693_v0 = vld [vmem:[%s258_s10] ss:$0 sm:$0xff] }
  0x6d   : > { %301 = vst [vmem:[%s1265_s11] sm:$0xff] %v693_v0 }
  0x6e PF: > { %v319_v1 = vld [vmem:[%s1251_s23 + $0x78] sm:$0xff]  ;;  %v318_v2 = vld [vmem:[%s1251_s23 + $0x70] sm:$0xff]  ;;  %v317_v3 = vld [vmem:[%s1251_s23 + $0x68] sm:$0xff]  ;;  %s1425_s7 = sld [smem:[#allocation18_spill]]  ;;  %s357_s15 = sshll.u32 %s1265_s11, 4  ;;  %s358_s15 = int_to_ptr.vmem [resolvable:$true] %s357_s15 }
  0x6f   : > { %320 = vmatpush.msra.mxu0 %v319_v1  ;;  %v316_v4 = vld [vmem:[%s1251_s23 + $0x60] sm:$0xff]  ;;  %v315_v5 = vld [vmem:[%s1251_s23 + $0x58] sm:$0xff]  ;;  %v314_v6 = vld [vmem:[%s1251_s23 + $0x50] sm:$0xff]  ;;  %s1426_s24 = sld [smem:[#allocation17_spill]]  ;;  %s343_s9 = scalar_lea.sflag [#allocation4], %s288_s8 }
  0x70   : > { %v313_v7 = vld [vmem:[%s1251_s23 + $0x48] sm:$0xff]  ;;  %v312_v8 = vld [vmem:[%s1251_s23 + $0x40] sm:$0xff]  ;;  %v311_v9 = vld [vmem:[%s1251_s23 + $0x38] sm:$0xff]  ;;  %s1427_s5 = sld [smem:[#allocation29_spill]] }
  0x71   : > { %321 = vmatpush.msra.mxu0 %v318_v2  ;;  %v310_v10 = vld [vmem:[%s1251_s23 + $0x30] sm:$0xff]  ;;  %v309_v11 = vld [vmem:[%s1251_s23 + $0x28] sm:$0xff]  ;;  %v308_v12 = vld [vmem:[%s1251_s23 + $0x20] sm:$0xff] }
  0x72   : > { %v307_v13 = vld [vmem:[%s1251_s23 + $0x18] sm:$0xff]  ;;  %v306_v14 = vld [vmem:[%s1251_s23 + $0x10] sm:$0xff]  ;;  %v305_v15 = vld [vmem:[%s1251_s23 + $0x8] sm:$0xff] }
  0x73   : > { %322 = vmatpush.msra.mxu0 %v317_v3  ;;  %v304_v16 = vld [vmem:[%s1251_s23] sm:$0xff]  ;;  %v303_v17 = vld [vmem:[%s239_s29] sm:$0xff] }
  0x74   : > { %s508_s26 = sshll.u32 %s1425_s7, 1  ;;  %v302_v18 = vld [vmem:[%s1265_s11] sm:$0xff] }
  0x75   : > { %323 = vmatpush.msra.mxu0 %v316_v4  ;;  %s353_s6 = sadd.s32 %s1426_s24, %s508_s26 }
  0x76   : > { %s509_s3 = sshll.u32 %s353_s6, 3  ;;  %s804_s26 = scalar_lea.hbm %s1427_s5, 48 }
  0x77   : > { %324 = vmatpush.msra.mxu0 %v315_v5  ;;  %s355_s10 = scalar_lea.hbm %s1427_s5, %s509_s3 }
  0x78   : > { %s359_s4 = sshll.u32 %s355_s10, 4  ;;  %s360_s4 = int_to_ptr.hbm [resolvable:$true] %s359_s4 }
  0x79   : > { %325 = vmatpush.msra.mxu0 %v314_v6  ;;  %s798_s29 = sshra.s32 %s360_s4, 4  ;;  %s799_s29 = int_to_ptr.hbm [resolvable:$true] %s798_s29 }
  0x7a   : > { %s800_s23 = scalar_lea.hbm %s799_s29, 8  ;;  %p805_p7 = scmp.lt.s32.totalorder %s799_s29, %s1427_s5 }
  0x7b   : > { %326 = vmatpush.msra.mxu0 %v313_v7  ;;  %p801_p8 = scmp.ne.s32.totalorder %s799_s29, %s800_s23  ;;  %p806_p6 = scmp.lt.s32.totalorder %s804_s26, %s800_s23 }
  0x7d   : > { %327 = vmatpush.msra.mxu0 %v312_v8  ;;  %p802_p1 = pnand %p801_p8, %p1194_p2  ;;  %p807_p0 = por %p806_p6, %p805_p7 }
  0x7f   : > { %328 = vmatpush.msra.mxu0 %v311_v9  ;;  %p803_p4 = pneg %p802_p1 }
  0x81   : > { %329 = vmatpush.msra.mxu0 %v310_v10  ;;  %p808_p9 = pnand %p807_p0, %p803_p4 }
  0x83   : > { %330 = vmatpush.msra.mxu0 %v309_v11 }
  0x85   : > { %331 = vmatpush.msra.mxu0 %v308_v12 }
  0x87   : > { %332 = vmatpush.msra.mxu0 %v307_v13 }
  0x89   : > { %333 = vmatpush.msra.mxu0 %v306_v14 }
  0x8b   : > { %334 = vmatpush.msra.mxu0 %v305_v15 }
  0x8d   : > { %335 = vmatpush.msra.mxu0 %v304_v16 }
  0x8e   : > { %336 = vmatmul.f32.vlgmr.msra.gmra.mxu0 %v303_v17 }
 0x10b   : > { %v337_v19 = vpop.f32.mrf.mxu0 }
 0x10c   : > { %v340_v20 = vadd.f32 %v337_v19, %v302_v18 }
 0x10e   : > { %341 = vst [vmem:[%s1265_s11] sm:$0xff] %v340_v20 }
 0x10f   : > { %811 = shalt.err (!%p808_p9)
}
 0x110   : > { %520 = dma.vmem_to_hbm [thread:$0]  (%p1194_p2), %s358_s15, 128, %s360_s4, %s343_s9  }
 0x111 PF: > { %p537_p10 = scmp.ge.s32.totalorder %s978_s30, 2  ;;  %s371_s8 = sand.u32 1, %s906_s12  }
 0x112   : > { %p1428_p12 = scmp.ne.s32.totalorder %s1417_s22, 0  ;;  %s372_s11 = scalar_lea.sflag [#allocation4], %s371_s8 }
 0x114   : > { %p533_p13 = pnand %p537_p10, %p1428_p12 }
 0x116   : > { %p534_p5 = pneg %p533_p13 }
 0x118   : > { %901 = dma.done.wait (%p534_p5), %s372_s11, 128  }
 0x119   : > { %903 = vsyncadd (%p534_p5), %s372_s11, 4294967168  ;;  %s22_s30 = sadd.s32 1, %s978_s30   ;;  %s1430_s1 = sld [smem:[#allocation13_spill]] }
 0x11a   : > { %p1312_p11 = scmp.ge.s32.totalorder %s22_s30, 20   ;;  %s1431_s20 = sld [smem:[#allocation26_spill]] }
 0x11b   : > { %s1432_s22 = sld [smem:[#allocation14_spill]]  ;;  %s1437_s12 = smov %s910_s13 }
 0x11c   : > { %s1433_s10 = sld [smem:[#allocation15_spill]]  ;;  %s1439_s13 = smov %s914_s14 }
 0x11d   : > { %s1434_s23 = sld [smem:[#allocation27_spill]]  ;;  %s1441_s14 = smov %s1192_s21 }
 0x11e   : > { %s1435_s26 = sld [smem:[#allocation19_spill]]  ;;  %s1442_s15 = smov %s922_s16 }
 0x11f   : > { %s1436_s4 = sld [smem:[#allocation21_spill]]  ;;  %s1444_s16 = smov %s926_s17 }
 0x120   : > { %s1438_s9 = sld [smem:[#allocation22_spill]]  ;;  %s1445_s17 = smov %s1219_s18 }
 0x121   : > { %s1440_s29 = sld [smem:[#allocation25_spill]]  ;;  %s1446_s18 = smov %s934_s19 }
 0x122   : > { %s1447_s19 = smov %s1430_s1  ;;  %s1448_s21 = smov %s1432_s22 }
 0x123   : > { %s1449_s22 = smov %s1433_s10  ;;  %s1450_s24 = smov %s966_s27 }
 0x124   : > { %s1451_s25 = smov %s970_s28  ;;  %21 = sbr.rel (!%p1312_p11) target bundleno = 18 (0x12), region = 105 }
 0x125   : > { %s1452_s27 = smov %s1436_s4 }
 0x126   : > { %s1453_s28 = smov %s1438_s9 }
 0x129   :  { %378 = vsyncpa [#allocation3], 1 }
 0x12a   :  { %380 = vsyncpa [#allocation3 + $0x1], 1 }
 0x12b   :  { %381 = vsyncpa [#allocation6], 1 }
 0x12c   :  { %383 = vsyncpa [#allocation6 + $0x1], 1 }
 0x12d   :  { %384 = vsyncpa [#allocation4], 1 }
 0x12e   :  { %386 = vsyncpa [#allocation4 + $0x1], 1 }

</bundles_post_ra>
